<compile_context>
chip_gen: v7x
topology: tpu7x:2x2x1
jax: 0.10.0
libtpu: 0.0.40
codegen_flags: <defaults>
</compile_context>

<pallas_src>
import math

import jax
import jax.numpy as jnp
from jax import lax
from jax.experimental import pallas as pl
from jax.experimental.pallas import tpu as pltpu


def make_lidl_lstm_kernel(seq, batch, input_size, hidden, os_factor,
                          max_full_unroll=64, fori_unroll=4):
    S, B, I, H = seq, batch, input_size, hidden
    delay_near = int(math.floor(os_factor))
    delay_far = int(math.ceil(os_factor))
    alpha = float(os_factor - delay_near)
    assert delay_far <= S, "delay larger than sequence length is unsupported"

    # Common case (os_factor == 1.0): plain LSTM recurrence with register carry.
    fast_path = (alpha == 0.0) and (delay_near == 1)

    def kernel(x_ref, wih_ref, whh_ref, b_ref, h_ref, c_ref, gx_ref):
        # ---- Phase 1: hoisted input projection, one MXU matmul for all steps.
        # x_ref is pre-flattened to (S*B, I) by the wrapper (no in-kernel
        # reshapes needed).  Bias is folded in here, once.
        gx_ref[...] = (
            jnp.dot(x_ref[...], wih_ref[...],
                    preferred_element_type=jnp.float32)
            + b_ref[...])

        # Load the recurrent weight once; close over it in the loop body.
        whh = whh_ref[...]
        zeros_bh = jnp.zeros((B, H), jnp.float32)

        def cell(i, h_prev, c_prev):
            # i*B is static in the unrolled path, dynamic in the fori path.
            gates = gx_ref[pl.ds(i * B, B), :] + jnp.dot(
                h_prev, whh, preferred_element_type=jnp.float32)
            s = jax.nn.sigmoid(gates)            # full-width (B, 4H)
            t = jnp.tanh(gates)                  # full-width (B, 4H)
            i_g = s[:, 0 * H:1 * H]
            f_g = s[:, 1 * H:2 * H]
            g_g = t[:, 2 * H:3 * H]
            o_g = s[:, 3 * H:4 * H]
            c_new = f_g * c_prev + i_g * g_g
            h_new = o_g * jnp.tanh(c_new)
            h_ref[i] = h_new
            c_ref[i] = c_new
            return h_new, c_new

        if fast_path:
            # Classic LSTM recurrence: carry h, c as values so the serial
            # dependence chain never round-trips through VMEM.
            if S <= max_full_unroll:
                h, c = zeros_bh, zeros_bh
                for i in range(S):
                    h, c = cell(i, h, c)
            else:
                def body(i, carry):
                    return cell(i, *carry)
                lax.fori_loop(0, S, body, (zeros_bh, zeros_bh),
                              unroll=fori_unroll)
        else:
            def read_blend(i, near_zero, far_zero):
                # near_zero / far_zero are trace-time Python bools.
                if near_zero:
                    h_n, c_n = zeros_bh, zeros_bh
                else:
                    h_n = h_ref[i - delay_near]
                    c_n = c_ref[i - delay_near]
                if alpha == 0.0:
                    return h_n, c_n
                if far_zero:
                    h_f, c_f = zeros_bh, zeros_bh
                else:
                    h_f = h_ref[i - delay_far]
                    c_f = c_ref[i - delay_far]
                return ((1.0 - alpha) * h_n + alpha * h_f,
                        (1.0 - alpha) * c_n + alpha * c_f)

            # Peel the first `delay_far` iterations at trace time: they are the
            # only ones that consume the zero initial state (PyTorch negative
            # indexing into the zero-initialized buffer), so no full-buffer
            # zero init of the outputs is needed.
            n_peel = min(delay_far, S)
            for i in range(n_peel):
                h_prev, c_prev = read_blend(
                    i,
                    near_zero=(delay_near == 0 or i < delay_near),
                    far_zero=(delay_far == 0 or i < delay_far))
                cell(i, h_prev, c_prev)

            if S > n_peel:
                near_zero_main = (delay_near == 0)
                far_zero_main = (delay_far == 0)
                if S <= max_full_unroll:
                    for i in range(n_peel, S):
                        h_prev, c_prev = read_blend(
                            i, near_zero_main, far_zero_main)
                        cell(i, h_prev, c_prev)
                else:
                    def body(i, carry):
                        h_prev, c_prev = read_blend(
                            i, near_zero_main, far_zero_main)
                        cell(i, h_prev, c_prev)
                        return carry
                    lax.fori_loop(n_peel, S, body, 0, unroll=fori_unroll)

    return kernel


def lidl_lstm_forward(x, w_ih, w_hh, b_ih, b_hh, os_factor=1.0):
    """x: (batch, seq, input) f32; w_ih: (4H, I); w_hh: (4H, H); biases: (4H,)."""
    B, S, I = x.shape
    H = w_hh.shape[1]

    # Time-major, flattened to (S*B, I) so the hoisted input projection is a
    # single plain 2-D matmul inside the kernel (wrapper-side layout plumbing).
    x_flat = jnp.transpose(x, (1, 0, 2)).reshape(S * B, I)
    wih_t = jnp.transpose(w_ih)                  # (I, 4H)
    whh_t = jnp.transpose(w_hh)                  # (H, 4H)
    b = (b_ih + b_hh).reshape(1, 4 * H)          # combined bias

    kernel = make_lidl_lstm_kernel(S, B, I, H, os_factor)

    # Fully VMEM-resident design; only raise the scoped VMEM limit if the
    # resident footprint approaches the 16 MiB v5e scoped default.
    resident_bytes = 4 * (x_flat.size + wih_t.size + whh_t.size + b.size
                          + 2 * S * B * H          # h, c outputs
                          + S * B * 4 * H)         # gx scratch
    compiler_params = None
    if resident_bytes > 12 * 2**20:
        compiler_params = pltpu.CompilerParams(
            vmem_limit_bytes=min(int(resident_bytes * 1.5) + (2 << 20),
                                 100 * 2**20))

    h_all, c_all = pl.pallas_call(
        kernel,
        out_shape=(jax.ShapeDtypeStruct((S, B, H), jnp.float32),
                   jax.ShapeDtypeStruct((S, B, H), jnp.float32)),
        in_specs=[pl.BlockSpec(memory_space=pltpu.MemorySpace.VMEM)] * 4,
        out_specs=(pl.BlockSpec(memory_space=pltpu.MemorySpace.VMEM),
                   pl.BlockSpec(memory_space=pltpu.MemorySpace.VMEM)),
        scratch_shapes=[pltpu.VMEM((S * B, 4 * H), jnp.float32)],
        compiler_params=compiler_params,
    )(x_flat, wih_t, whh_t, b)

    # Back to the PyTorch batch-major convention.
    h_all = jnp.transpose(h_all, (1, 0, 2))      # (B, S, H)
    c_all = jnp.transpose(c_all, (1, 0, 2))      # (B, S, H)
    # Matches torch return: (states[..., :H], vector_to_tuple(states))
    return h_all, (h_all, c_all)


def lidl_lstm_reference(x, w_ih, w_hh, b_ih, b_hh, os_factor=1.0):
    """Pure-JAX reference mirroring the PyTorch loop exactly."""
    B, S, I = x.shape
    H = w_hh.shape[1]
    delay_near = math.floor(os_factor)
    delay_far = math.ceil(os_factor)
    alpha = os_factor - delay_near
    states = jnp.zeros((B, S, 2 * H), jnp.float32)
    for i in range(S):
        hr = ((1.0 - alpha) * states[:, (i - delay_near) % S, :]
              + alpha * states[:, (i - delay_far) % S, :])
        h_prev, c_prev = hr[:, :H], hr[:, H:]
        gates = x[:, i, :] @ w_ih.T + b_ih + h_prev @ w_hh.T + b_hh
        ig = jax.nn.sigmoid(gates[:, :H])
        fg = jax.nn.sigmoid(gates[:, H:2 * H])
        gg = jnp.tanh(gates[:, 2 * H:3 * H])
        og = jax.nn.sigmoid(gates[:, 3 * H:])
        c = fg * c_prev + ig * gg
        h = og * jnp.tanh(c)
        states = states.at[:, i, :].set(jnp.concatenate([h, c], axis=-1))
    return states[..., :H], (states[..., :H], states[..., H:])


if __name__ == "__main__":
    # Small shapes consistent with the module: batch=2, seq=8, input=32, hidden=32.
    B, S, I, H = 2, 8, 32, 32

    key = jax.random.PRNGKey(0)
    kx, k1, k2, k3, k4 = jax.random.split(key, 5)
    x = jax.random.normal(kx, (B, S, I), dtype=jnp.float32)

    # PyTorch-style LSTMCell init: uniform(-1/sqrt(H), 1/sqrt(H)).
    bound = 1.0 / math.sqrt(H)
    w_ih = jax.random.uniform(k1, (4 * H, I), jnp.float32, -bound, bound)
    w_hh = jax.random.uniform(k2, (4 * H, H), jnp.float32, -bound, bound)
    b_ih = jax.random.uniform(k3, (4 * H,), jnp.float32, -bound, bound)
    b_hh = jax.random.uniform(k4, (4 * H,), jnp.float32, -bound, bound)

    # os_factor = 1.0 exercises the fast (register-carry) path,
    # os_factor = 1.5 exercises the general fractional-delay blend path.
    for osf in (1.0, 1.5):
        out, (h_all, c_all) = lidl_lstm_forward(x, w_ih, w_hh, b_ih, b_hh, osf)
        jax.block_until_ready(out)
        jax.block_until_ready(h_all)
        jax.block_until_ready(c_all)

        out_ref, (h_ref, c_ref) = lidl_lstm_reference(
            x, w_ih, w_hh, b_ih, b_hh, osf)
        assert out.shape == (B, S, H)
        assert h_all.shape == (B, S, H) and c_all.shape == (B, S, H)
        assert jnp.allclose(out, out_ref, atol=1e-4, rtol=1e-4)
        assert jnp.allclose(h_all, h_ref, atol=1e-4, rtol=1e-4)
        assert jnp.allclose(c_all, c_ref, atol=1e-4, rtol=1e-4)

    print("KERNEL_OK")
</pallas_src>

<mosaic_0001>
module attributes {stable_mosaic.version = 11 : i64} {
  func.func @kernel(%arg0: memref<16x32xf32, #tpu.memory_space<vmem>>, %arg1: memref<32x128xf32, #tpu.memory_space<vmem>>, %arg2: memref<32x128xf32, #tpu.memory_space<vmem>>, %arg3: memref<1x128xf32, #tpu.memory_space<vmem>>, %arg4: memref<8x2x32xf32, #tpu.memory_space<vmem>>, %arg5: memref<8x2x32xf32, #tpu.memory_space<vmem>>, %arg6: memref<16x128xf32, #tpu.memory_space<vmem>>) attributes {dimension_semantics = [], scalar_prefetch = 0 : i64, scratch_operands = 1 : i64, tpu.core_type = #tpu.core_type<tc>} {
    %c0 = arith.constant 0 : index
    %c0_0 = arith.constant 0 : index
    %0 = vector.load %arg0[%c0, %c0_0] : memref<16x32xf32, #tpu.memory_space<vmem>>, vector<16x32xf32>
    %c0_1 = arith.constant 0 : index
    %c0_2 = arith.constant 0 : index
    %1 = vector.load %arg1[%c0_1, %c0_2] : memref<32x128xf32, #tpu.memory_space<vmem>>, vector<32x128xf32>
    %cst = arith.constant dense<0.000000e+00> : vector<16x128xf32>
    %2 = tpu.matmul %0, %1, %cst {dimension_numbers = #tpu.dot_dimension_numbers<[1], [0], [0], [1], [0, 0, 1, 1], [], []>} : vector<16x32xf32>, vector<32x128xf32>, vector<16x128xf32> -> vector<16x128xf32>
    %c0_3 = arith.constant 0 : index
    %c0_4 = arith.constant 0 : index
    %3 = vector.load %arg3[%c0_3, %c0_4] : memref<1x128xf32, #tpu.memory_space<vmem>>, vector<1x128xf32>
    %4 = vector.broadcast %3 : vector<1x128xf32> to vector<16x128xf32>
    %5 = arith.addf %2, %4 : vector<16x128xf32>
    %c0_5 = arith.constant 0 : index
    %c0_6 = arith.constant 0 : index
    %6 = vector.load %arg6[%c0_5, %c0_6] : memref<16x128xf32, #tpu.memory_space<vmem>>, vector<16x128xf32>
    tpu.vector_store %arg6[%c0_5, %c0_6], %5 {strides = array<i32>} : memref<16x128xf32, #tpu.memory_space<vmem>>, vector<16x128xf32>,
    %c0_7 = arith.constant 0 : index
    %c0_8 = arith.constant 0 : index
    %7 = vector.load %arg2[%c0_7, %c0_8] : memref<32x128xf32, #tpu.memory_space<vmem>>, vector<32x128xf32>
    %cst_9 = arith.constant 0.000000e+00 : f32
    %8 = vector.broadcast %cst_9 : f32 to vector<2x32xf32>
    %c0_10 = arith.constant 0 : index
    %c0_11 = arith.constant 0 : index
    %9 = vector.load %arg6[%c0_10, %c0_11] : memref<16x128xf32, #tpu.memory_space<vmem>>, vector<2x128xf32>
    %cst_12 = arith.constant dense<0.000000e+00> : vector<2x128xf32>
    %10 = tpu.matmul %8, %7, %cst_12 {dimension_numbers = #tpu.dot_dimension_numbers<[1], [0], [0], [1], [0, 0, 1, 1], [], []>} : vector<2x32xf32>, vector<32x128xf32>, vector<2x128xf32> -> vector<2x128xf32>
    %11 = arith.addf %9, %10 : vector<2x128xf32>
    %12 = arith.negf %11 : vector<2x128xf32>
    %13 = math.exp %12 : vector<2x128xf32>
    %cst_13 = arith.constant 1.000000e+00 : f32
    %14 = vector.broadcast %cst_13 : f32 to vector<2x128xf32>
    %15 = arith.addf %14, %13 : vector<2x128xf32>
    %16 = arith.divf %14, %15 : vector<2x128xf32>
    %17 = math.tanh %11 : vector<2x128xf32>
    %18 = vector.extract_strided_slice %16 {offsets = [0, 0], sizes = [2, 32], strides = [1, 1]} : vector<2x128xf32> to vector<2x32xf32>
    %19 = vector.extract_strided_slice %16 {offsets = [0, 32], sizes = [2, 32], strides = [1, 1]} : vector<2x128xf32> to vector<2x32xf32>
    %20 = vector.extract_strided_slice %17 {offsets = [0, 64], sizes = [2, 32], strides = [1, 1]} : vector<2x128xf32> to vector<2x32xf32>
    %21 = vector.extract_strided_slice %16 {offsets = [0, 96], sizes = [2, 32], strides = [1, 1]} : vector<2x128xf32> to vector<2x32xf32>
    %22 = arith.mulf %19, %8 : vector<2x32xf32>
    %23 = arith.mulf %18, %20 : vector<2x32xf32>
    %24 = arith.addf %22, %23 : vector<2x32xf32>
    %25 = math.tanh %24 : vector<2x32xf32>
    %26 = arith.mulf %21, %25 : vector<2x32xf32>
    %c0_14 = arith.constant 0 : index
    %c0_15 = arith.constant 0 : index
    %c0_16 = arith.constant 0 : index
    %27 = vector.load %arg4[%c0_14, %c0_15, %c0_16] : memref<8x2x32xf32, #tpu.memory_space<vmem>>, vector<1x2x32xf32>
    %28 = vector.shape_cast %27 : vector<1x2x32xf32> to vector<2x32xf32>
    %29 = vector.shape_cast %26 : vector<2x32xf32> to vector<1x2x32xf32>
    tpu.vector_store %arg4[%c0_14, %c0_15, %c0_16], %29 {strides = array<i32>} : memref<8x2x32xf32, #tpu.memory_space<vmem>>, vector<1x2x32xf32>,
    %c0_17 = arith.constant 0 : index
    %c0_18 = arith.constant 0 : index
    %c0_19 = arith.constant 0 : index
    %30 = vector.load %arg5[%c0_17, %c0_18, %c0_19] : memref<8x2x32xf32, #tpu.memory_space<vmem>>, vector<1x2x32xf32>
    %31 = vector.shape_cast %30 : vector<1x2x32xf32> to vector<2x32xf32>
    %32 = vector.shape_cast %24 : vector<2x32xf32> to vector<1x2x32xf32>
    tpu.vector_store %arg5[%c0_17, %c0_18, %c0_19], %32 {strides = array<i32>} : memref<8x2x32xf32, #tpu.memory_space<vmem>>, vector<1x2x32xf32>,
    %c2 = arith.constant 2 : index
    %c0_20 = arith.constant 0 : index
    %33 = vector.load %arg6[%c2, %c0_20] : memref<16x128xf32, #tpu.memory_space<vmem>>, vector<2x128xf32>
    %cst_21 = arith.constant dense<0.000000e+00> : vector<2x128xf32>
    %34 = tpu.matmul %26, %7, %cst_21 {dimension_numbers = #tpu.dot_dimension_numbers<[1], [0], [0], [1], [0, 0, 1, 1], [], []>} : vector<2x32xf32>, vector<32x128xf32>, vector<2x128xf32> -> vector<2x128xf32>
    %35 = arith.addf %33, %34 : vector<2x128xf32>
    %36 = arith.negf %35 : vector<2x128xf32>
    %37 = math.exp %36 : vector<2x128xf32>
    %cst_22 = arith.constant 1.000000e+00 : f32
    %38 = vector.broadcast %cst_22 : f32 to vector<2x128xf32>
    %39 = arith.addf %38, %37 : vector<2x128xf32>
    %40 = arith.divf %38, %39 : vector<2x128xf32>
    %41 = math.tanh %35 : vector<2x128xf32>
    %42 = vector.extract_strided_slice %40 {offsets = [0, 0], sizes = [2, 32], strides = [1, 1]} : vector<2x128xf32> to vector<2x32xf32>
    %43 = vector.extract_strided_slice %40 {offsets = [0, 32], sizes = [2, 32], strides = [1, 1]} : vector<2x128xf32> to vector<2x32xf32>
    %44 = vector.extract_strided_slice %41 {offsets = [0, 64], sizes = [2, 32], strides = [1, 1]} : vector<2x128xf32> to vector<2x32xf32>
    %45 = vector.extract_strided_slice %40 {offsets = [0, 96], sizes = [2, 32], strides = [1, 1]} : vector<2x128xf32> to vector<2x32xf32>
    %46 = arith.mulf %43, %24 : vector<2x32xf32>
    %47 = arith.mulf %42, %44 : vector<2x32xf32>
    %48 = arith.addf %46, %47 : vector<2x32xf32>
    %49 = math.tanh %48 : vector<2x32xf32>
    %50 = arith.mulf %45, %49 : vector<2x32xf32>
    %c1 = arith.constant 1 : index
    %c0_23 = arith.constant 0 : index
    %c0_24 = arith.constant 0 : index
    %51 = vector.load %arg4[%c1, %c0_23, %c0_24] : memref<8x2x32xf32, #tpu.memory_space<vmem>>, vector<1x2x32xf32>
    %52 = vector.shape_cast %51 : vector<1x2x32xf32> to vector<2x32xf32>
    %53 = vector.shape_cast %50 : vector<2x32xf32> to vector<1x2x32xf32>
    tpu.vector_store %arg4[%c1, %c0_23, %c0_24], %53 {strides = array<i32>} : memref<8x2x32xf32, #tpu.memory_space<vmem>>, vector<1x2x32xf32>,
    %c1_25 = arith.constant 1 : index
    %c0_26 = arith.constant 0 : index
    %c0_27 = arith.constant 0 : index
    %54 = vector.load %arg5[%c1_25, %c0_26, %c0_27] : memref<8x2x32xf32, #tpu.memory_space<vmem>>, vector<1x2x32xf32>
    %55 = vector.shape_cast %54 : vector<1x2x32xf32> to vector<2x32xf32>
    %56 = vector.shape_cast %48 : vector<2x32xf32> to vector<1x2x32xf32>
    tpu.vector_store %arg5[%c1_25, %c0_26, %c0_27], %56 {strides = array<i32>} : memref<8x2x32xf32, #tpu.memory_space<vmem>>, vector<1x2x32xf32>,
    %c4 = arith.constant 4 : index
    %c0_28 = arith.constant 0 : index
    %57 = vector.load %arg6[%c4, %c0_28] : memref<16x128xf32, #tpu.memory_space<vmem>>, vector<2x128xf32>
    %cst_29 = arith.constant dense<0.000000e+00> : vector<2x128xf32>
    %58 = tpu.matmul %50, %7, %cst_29 {dimension_numbers = #tpu.dot_dimension_numbers<[1], [0], [0], [1], [0, 0, 1, 1], [], []>} : vector<2x32xf32>, vector<32x128xf32>, vector<2x128xf32> -> vector<2x128xf32>
    %59 = arith.addf %57, %58 : vector<2x128xf32>
    %60 = arith.negf %59 : vector<2x128xf32>
    %61 = math.exp %60 : vector<2x128xf32>
    %cst_30 = arith.constant 1.000000e+00 : f32
    %62 = vector.broadcast %cst_30 : f32 to vector<2x128xf32>
    %63 = arith.addf %62, %61 : vector<2x128xf32>
    %64 = arith.divf %62, %63 : vector<2x128xf32>
    %65 = math.tanh %59 : vector<2x128xf32>
    %66 = vector.extract_strided_slice %64 {offsets = [0, 0], sizes = [2, 32], strides = [1, 1]} : vector<2x128xf32> to vector<2x32xf32>
    %67 = vector.extract_strided_slice %64 {offsets = [0, 32], sizes = [2, 32], strides = [1, 1]} : vector<2x128xf32> to vector<2x32xf32>
    %68 = vector.extract_strided_slice %65 {offsets = [0, 64], sizes = [2, 32], strides = [1, 1]} : vector<2x128xf32> to vector<2x32xf32>
    %69 = vector.extract_strided_slice %64 {offsets = [0, 96], sizes = [2, 32], strides = [1, 1]} : vector<2x128xf32> to vector<2x32xf32>
    %70 = arith.mulf %67, %48 : vector<2x32xf32>
    %71 = arith.mulf %66, %68 : vector<2x32xf32>
    %72 = arith.addf %70, %71 : vector<2x32xf32>
    %73 = math.tanh %72 : vector<2x32xf32>
    %74 = arith.mulf %69, %73 : vector<2x32xf32>
    %c2_31 = arith.constant 2 : index
    %c0_32 = arith.constant 0 : index
    %c0_33 = arith.constant 0 : index
    %75 = vector.load %arg4[%c2_31, %c0_32, %c0_33] : memref<8x2x32xf32, #tpu.memory_space<vmem>>, vector<1x2x32xf32>
    %76 = vector.shape_cast %75 : vector<1x2x32xf32> to vector<2x32xf32>
    %77 = vector.shape_cast %74 : vector<2x32xf32> to vector<1x2x32xf32>
    tpu.vector_store %arg4[%c2_31, %c0_32, %c0_33], %77 {strides = array<i32>} : memref<8x2x32xf32, #tpu.memory_space<vmem>>, vector<1x2x32xf32>,
    %c2_34 = arith.constant 2 : index
    %c0_35 = arith.constant 0 : index
    %c0_36 = arith.constant 0 : index
    %78 = vector.load %arg5[%c2_34, %c0_35, %c0_36] : memref<8x2x32xf32, #tpu.memory_space<vmem>>, vector<1x2x32xf32>
    %79 = vector.shape_cast %78 : vector<1x2x32xf32> to vector<2x32xf32>
    %80 = vector.shape_cast %72 : vector<2x32xf32> to vector<1x2x32xf32>
    tpu.vector_store %arg5[%c2_34, %c0_35, %c0_36], %80 {strides = array<i32>} : memref<8x2x32xf32, #tpu.memory_space<vmem>>, vector<1x2x32xf32>,
    %c6 = arith.constant 6 : index
    %c0_37 = arith.constant 0 : index
    %81 = vector.load %arg6[%c6, %c0_37] : memref<16x128xf32, #tpu.memory_space<vmem>>, vector<2x128xf32>
    %cst_38 = arith.constant dense<0.000000e+00> : vector<2x128xf32>
    %82 = tpu.matmul %74, %7, %cst_38 {dimension_numbers = #tpu.dot_dimension_numbers<[1], [0], [0], [1], [0, 0, 1, 1], [], []>} : vector<2x32xf32>, vector<32x128xf32>, vector<2x128xf32> -> vector<2x128xf32>
    %83 = arith.addf %81, %82 : vector<2x128xf32>
    %84 = arith.negf %83 : vector<2x128xf32>
    %85 = math.exp %84 : vector<2x128xf32>
    %cst_39 = arith.constant 1.000000e+00 : f32
    %86 = vector.broadcast %cst_39 : f32 to vector<2x128xf32>
    %87 = arith.addf %86, %85 : vector<2x128xf32>
    %88 = arith.divf %86, %87 : vector<2x128xf32>
    %89 = math.tanh %83 : vector<2x128xf32>
    %90 = vector.extract_strided_slice %88 {offsets = [0, 0], sizes = [2, 32], strides = [1, 1]} : vector<2x128xf32> to vector<2x32xf32>
    %91 = vector.extract_strided_slice %88 {offsets = [0, 32], sizes = [2, 32], strides = [1, 1]} : vector<2x128xf32> to vector<2x32xf32>
    %92 = vector.extract_strided_slice %89 {offsets = [0, 64], sizes = [2, 32], strides = [1, 1]} : vector<2x128xf32> to vector<2x32xf32>
    %93 = vector.extract_strided_slice %88 {offsets = [0, 96], sizes = [2, 32], strides = [1, 1]} : vector<2x128xf32> to vector<2x32xf32>
    %94 = arith.mulf %91, %72 : vector<2x32xf32>
    %95 = arith.mulf %90, %92 : vector<2x32xf32>
    %96 = arith.addf %94, %95 : vector<2x32xf32>
    %97 = math.tanh %96 : vector<2x32xf32>
    %98 = arith.mulf %93, %97 : vector<2x32xf32>
    %c3 = arith.constant 3 : index
    %c0_40 = arith.constant 0 : index
    %c0_41 = arith.constant 0 : index
    %99 = vector.load %arg4[%c3, %c0_40, %c0_41] : memref<8x2x32xf32, #tpu.memory_space<vmem>>, vector<1x2x32xf32>
    %100 = vector.shape_cast %99 : vector<1x2x32xf32> to vector<2x32xf32>
    %101 = vector.shape_cast %98 : vector<2x32xf32> to vector<1x2x32xf32>
    tpu.vector_store %arg4[%c3, %c0_40, %c0_41], %101 {strides = array<i32>} : memref<8x2x32xf32, #tpu.memory_space<vmem>>, vector<1x2x32xf32>,
    %c3_42 = arith.constant 3 : index
    %c0_43 = arith.constant 0 : index
    %c0_44 = arith.constant 0 : index
    %102 = vector.load %arg5[%c3_42, %c0_43, %c0_44] : memref<8x2x32xf32, #tpu.memory_space<vmem>>, vector<1x2x32xf32>
    %103 = vector.shape_cast %102 : vector<1x2x32xf32> to vector<2x32xf32>
    %104 = vector.shape_cast %96 : vector<2x32xf32> to vector<1x2x32xf32>
    tpu.vector_store %arg5[%c3_42, %c0_43, %c0_44], %104 {strides = array<i32>} : memref<8x2x32xf32, #tpu.memory_space<vmem>>, vector<1x2x32xf32>,
    %c8 = arith.constant 8 : index
    %c0_45 = arith.constant 0 : index
    %105 = vector.load %arg6[%c8, %c0_45] : memref<16x128xf32, #tpu.memory_space<vmem>>, vector<2x128xf32>
    %cst_46 = arith.constant dense<0.000000e+00> : vector<2x128xf32>
    %106 = tpu.matmul %98, %7, %cst_46 {dimension_numbers = #tpu.dot_dimension_numbers<[1], [0], [0], [1], [0, 0, 1, 1], [], []>} : vector<2x32xf32>, vector<32x128xf32>, vector<2x128xf32> -> vector<2x128xf32>
    %107 = arith.addf %105, %106 : vector<2x128xf32>
    %108 = arith.negf %107 : vector<2x128xf32>
    %109 = math.exp %108 : vector<2x128xf32>
    %cst_47 = arith.constant 1.000000e+00 : f32
    %110 = vector.broadcast %cst_47 : f32 to vector<2x128xf32>
    %111 = arith.addf %110, %109 : vector<2x128xf32>
    %112 = arith.divf %110, %111 : vector<2x128xf32>
    %113 = math.tanh %107 : vector<2x128xf32>
    %114 = vector.extract_strided_slice %112 {offsets = [0, 0], sizes = [2, 32], strides = [1, 1]} : vector<2x128xf32> to vector<2x32xf32>
    %115 = vector.extract_strided_slice %112 {offsets = [0, 32], sizes = [2, 32], strides = [1, 1]} : vector<2x128xf32> to vector<2x32xf32>
    %116 = vector.extract_strided_slice %113 {offsets = [0, 64], sizes = [2, 32], strides = [1, 1]} : vector<2x128xf32> to vector<2x32xf32>
    %117 = vector.extract_strided_slice %112 {offsets = [0, 96], sizes = [2, 32], strides = [1, 1]} : vector<2x128xf32> to vector<2x32xf32>
    %118 = arith.mulf %115, %96 : vector<2x32xf32>
    %119 = arith.mulf %114, %116 : vector<2x32xf32>
    %120 = arith.addf %118, %119 : vector<2x32xf32>
    %121 = math.tanh %120 : vector<2x32xf32>
    %122 = arith.mulf %117, %121 : vector<2x32xf32>
    %c4_48 = arith.constant 4 : index
    %c0_49 = arith.constant 0 : index
    %c0_50 = arith.constant 0 : index
    %123 = vector.load %arg4[%c4_48, %c0_49, %c0_50] : memref<8x2x32xf32, #tpu.memory_space<vmem>>, vector<1x2x32xf32>
    %124 = vector.shape_cast %123 : vector<1x2x32xf32> to vector<2x32xf32>
    %125 = vector.shape_cast %122 : vector<2x32xf32> to vector<1x2x32xf32>
    tpu.vector_store %arg4[%c4_48, %c0_49, %c0_50], %125 {strides = array<i32>} : memref<8x2x32xf32, #tpu.memory_space<vmem>>, vector<1x2x32xf32>,
    %c4_51 = arith.constant 4 : index
    %c0_52 = arith.constant 0 : index
    %c0_53 = arith.constant 0 : index
    %126 = vector.load %arg5[%c4_51, %c0_52, %c0_53] : memref<8x2x32xf32, #tpu.memory_space<vmem>>, vector<1x2x32xf32>
    %127 = vector.shape_cast %126 : vector<1x2x32xf32> to vector<2x32xf32>
    %128 = vector.shape_cast %120 : vector<2x32xf32> to vector<1x2x32xf32>
    tpu.vector_store %arg5[%c4_51, %c0_52, %c0_53], %128 {strides = array<i32>} : memref<8x2x32xf32, #tpu.memory_space<vmem>>, vector<1x2x32xf32>,
    %c10 = arith.constant 10 : index
    %c0_54 = arith.constant 0 : index
    %129 = vector.load %arg6[%c10, %c0_54] : memref<16x128xf32, #tpu.memory_space<vmem>>, vector<2x128xf32>
    %cst_55 = arith.constant dense<0.000000e+00> : vector<2x128xf32>
    %130 = tpu.matmul %122, %7, %cst_55 {dimension_numbers = #tpu.dot_dimension_numbers<[1], [0], [0], [1], [0, 0, 1, 1], [], []>} : vector<2x32xf32>, vector<32x128xf32>, vector<2x128xf32> -> vector<2x128xf32>
    %131 = arith.addf %129, %130 : vector<2x128xf32>
    %132 = arith.negf %131 : vector<2x128xf32>
    %133 = math.exp %132 : vector<2x128xf32>
    %cst_56 = arith.constant 1.000000e+00 : f32
    %134 = vector.broadcast %cst_56 : f32 to vector<2x128xf32>
    %135 = arith.addf %134, %133 : vector<2x128xf32>
    %136 = arith.divf %134, %135 : vector<2x128xf32>
    %137 = math.tanh %131 : vector<2x128xf32>
    %138 = vector.extract_strided_slice %136 {offsets = [0, 0], sizes = [2, 32], strides = [1, 1]} : vector<2x128xf32> to vector<2x32xf32>
    %139 = vector.extract_strided_slice %136 {offsets = [0, 32], sizes = [2, 32], strides = [1, 1]} : vector<2x128xf32> to vector<2x32xf32>
    %140 = vector.extract_strided_slice %137 {offsets = [0, 64], sizes = [2, 32], strides = [1, 1]} : vector<2x128xf32> to vector<2x32xf32>
    %141 = vector.extract_strided_slice %136 {offsets = [0, 96], sizes = [2, 32], strides = [1, 1]} : vector<2x128xf32> to vector<2x32xf32>
    %142 = arith.mulf %139, %120 : vector<2x32xf32>
    %143 = arith.mulf %138, %140 : vector<2x32xf32>
    %144 = arith.addf %142, %143 : vector<2x32xf32>
    %145 = math.tanh %144 : vector<2x32xf32>
    %146 = arith.mulf %141, %145 : vector<2x32xf32>
    %c5 = arith.constant 5 : index
    %c0_57 = arith.constant 0 : index
    %c0_58 = arith.constant 0 : index
    %147 = vector.load %arg4[%c5, %c0_57, %c0_58] : memref<8x2x32xf32, #tpu.memory_space<vmem>>, vector<1x2x32xf32>
    %148 = vector.shape_cast %147 : vector<1x2x32xf32> to vector<2x32xf32>
    %149 = vector.shape_cast %146 : vector<2x32xf32> to vector<1x2x32xf32>
    tpu.vector_store %arg4[%c5, %c0_57, %c0_58], %149 {strides = array<i32>} : memref<8x2x32xf32, #tpu.memory_space<vmem>>, vector<1x2x32xf32>,
    %c5_59 = arith.constant 5 : index
    %c0_60 = arith.constant 0 : index
    %c0_61 = arith.constant 0 : index
    %150 = vector.load %arg5[%c5_59, %c0_60, %c0_61] : memref<8x2x32xf32, #tpu.memory_space<vmem>>, vector<1x2x32xf32>
    %151 = vector.shape_cast %150 : vector<1x2x32xf32> to vector<2x32xf32>
    %152 = vector.shape_cast %144 : vector<2x32xf32> to vector<1x2x32xf32>
    tpu.vector_store %arg5[%c5_59, %c0_60, %c0_61], %152 {strides = array<i32>} : memref<8x2x32xf32, #tpu.memory_space<vmem>>, vector<1x2x32xf32>,
    %c12 = arith.constant 12 : index
    %c0_62 = arith.constant 0 : index
    %153 = vector.load %arg6[%c12, %c0_62] : memref<16x128xf32, #tpu.memory_space<vmem>>, vector<2x128xf32>
    %cst_63 = arith.constant dense<0.000000e+00> : vector<2x128xf32>
    %154 = tpu.matmul %146, %7, %cst_63 {dimension_numbers = #tpu.dot_dimension_numbers<[1], [0], [0], [1], [0, 0, 1, 1], [], []>} : vector<2x32xf32>, vector<32x128xf32>, vector<2x128xf32> -> vector<2x128xf32>
    %155 = arith.addf %153, %154 : vector<2x128xf32>
    %156 = arith.negf %155 : vector<2x128xf32>
    %157 = math.exp %156 : vector<2x128xf32>
    %cst_64 = arith.constant 1.000000e+00 : f32
    %158 = vector.broadcast %cst_64 : f32 to vector<2x128xf32>
    %159 = arith.addf %158, %157 : vector<2x128xf32>
    %160 = arith.divf %158, %159 : vector<2x128xf32>
    %161 = math.tanh %155 : vector<2x128xf32>
    %162 = vector.extract_strided_slice %160 {offsets = [0, 0], sizes = [2, 32], strides = [1, 1]} : vector<2x128xf32> to vector<2x32xf32>
    %163 = vector.extract_strided_slice %160 {offsets = [0, 32], sizes = [2, 32], strides = [1, 1]} : vector<2x128xf32> to vector<2x32xf32>
    %164 = vector.extract_strided_slice %161 {offsets = [0, 64], sizes = [2, 32], strides = [1, 1]} : vector<2x128xf32> to vector<2x32xf32>
    %165 = vector.extract_strided_slice %160 {offsets = [0, 96], sizes = [2, 32], strides = [1, 1]} : vector<2x128xf32> to vector<2x32xf32>
    %166 = arith.mulf %163, %144 : vector<2x32xf32>
    %167 = arith.mulf %162, %164 : vector<2x32xf32>
    %168 = arith.addf %166, %167 : vector<2x32xf32>
    %169 = math.tanh %168 : vector<2x32xf32>
    %170 = arith.mulf %165, %169 : vector<2x32xf32>
    %c6_65 = arith.constant 6 : index
    %c0_66 = arith.constant 0 : index
    %c0_67 = arith.constant 0 : index
    %171 = vector.load %arg4[%c6_65, %c0_66, %c0_67] : memref<8x2x32xf32, #tpu.memory_space<vmem>>, vector<1x2x32xf32>
    %172 = vector.shape_cast %171 : vector<1x2x32xf32> to vector<2x32xf32>
    %173 = vector.shape_cast %170 : vector<2x32xf32> to vector<1x2x32xf32>
    tpu.vector_store %arg4[%c6_65, %c0_66, %c0_67], %173 {strides = array<i32>} : memref<8x2x32xf32, #tpu.memory_space<vmem>>, vector<1x2x32xf32>,
    %c6_68 = arith.constant 6 : index
    %c0_69 = arith.constant 0 : index
    %c0_70 = arith.constant 0 : index
    %174 = vector.load %arg5[%c6_68, %c0_69, %c0_70] : memref<8x2x32xf32, #tpu.memory_space<vmem>>, vector<1x2x32xf32>
    %175 = vector.shape_cast %174 : vector<1x2x32xf32> to vector<2x32xf32>
    %176 = vector.shape_cast %168 : vector<2x32xf32> to vector<1x2x32xf32>
    tpu.vector_store %arg5[%c6_68, %c0_69, %c0_70], %176 {strides = array<i32>} : memref<8x2x32xf32, #tpu.memory_space<vmem>>, vector<1x2x32xf32>,
    %c14 = arith.constant 14 : index
    %c0_71 = arith.constant 0 : index
    %177 = vector.load %arg6[%c14, %c0_71] : memref<16x128xf32, #tpu.memory_space<vmem>>, vector<2x128xf32>
    %cst_72 = arith.constant dense<0.000000e+00> : vector<2x128xf32>
    %178 = tpu.matmul %170, %7, %cst_72 {dimension_numbers = #tpu.dot_dimension_numbers<[1], [0], [0], [1], [0, 0, 1, 1], [], []>} : vector<2x32xf32>, vector<32x128xf32>, vector<2x128xf32> -> vector<2x128xf32>
    %179 = arith.addf %177, %178 : vector<2x128xf32>
    %180 = arith.negf %179 : vector<2x128xf32>
    %181 = math.exp %180 : vector<2x128xf32>
    %cst_73 = arith.constant 1.000000e+00 : f32
    %182 = vector.broadcast %cst_73 : f32 to vector<2x128xf32>
    %183 = arith.addf %182, %181 : vector<2x128xf32>
    %184 = arith.divf %182, %183 : vector<2x128xf32>
    %185 = math.tanh %179 : vector<2x128xf32>
    %186 = vector.extract_strided_slice %184 {offsets = [0, 0], sizes = [2, 32], strides = [1, 1]} : vector<2x128xf32> to vector<2x32xf32>
    %187 = vector.extract_strided_slice %184 {offsets = [0, 32], sizes = [2, 32], strides = [1, 1]} : vector<2x128xf32> to vector<2x32xf32>
    %188 = vector.extract_strided_slice %185 {offsets = [0, 64], sizes = [2, 32], strides = [1, 1]} : vector<2x128xf32> to vector<2x32xf32>
    %189 = vector.extract_strided_slice %184 {offsets = [0, 96], sizes = [2, 32], strides = [1, 1]} : vector<2x128xf32> to vector<2x32xf32>
    %190 = arith.mulf %187, %168 : vector<2x32xf32>
    %191 = arith.mulf %186, %188 : vector<2x32xf32>
    %192 = arith.addf %190, %191 : vector<2x32xf32>
    %193 = math.tanh %192 : vector<2x32xf32>
    %194 = arith.mulf %189, %193 : vector<2x32xf32>
    %c7 = arith.constant 7 : index
    %c0_74 = arith.constant 0 : index
    %c0_75 = arith.constant 0 : index
    %195 = vector.load %arg4[%c7, %c0_74, %c0_75] : memref<8x2x32xf32, #tpu.memory_space<vmem>>, vector<1x2x32xf32>
    %196 = vector.shape_cast %195 : vector<1x2x32xf32> to vector<2x32xf32>
    %197 = vector.shape_cast %194 : vector<2x32xf32> to vector<1x2x32xf32>
    tpu.vector_store %arg4[%c7, %c0_74, %c0_75], %197 {strides = array<i32>} : memref<8x2x32xf32, #tpu.memory_space<vmem>>, vector<1x2x32xf32>,
    %c7_76 = arith.constant 7 : index
    %c0_77 = arith.constant 0 : index
    %c0_78 = arith.constant 0 : index
    %198 = vector.load %arg5[%c7_76, %c0_77, %c0_78] : memref<8x2x32xf32, #tpu.memory_space<vmem>>, vector<1x2x32xf32>
    %199 = vector.shape_cast %198 : vector<1x2x32xf32> to vector<2x32xf32>
    %200 = vector.shape_cast %192 : vector<2x32xf32> to vector<1x2x32xf32>
    tpu.vector_store %arg5[%c7_76, %c0_77, %c0_78], %200 {strides = array<i32>} : memref<8x2x32xf32, #tpu.memory_space<vmem>>, vector<1x2x32xf32>,
    return
  }
}

</mosaic_0001>

<bundles_post_ra>
// kernel: tpu_custom_call.1
= control target key start
LH: loop header
LB: loop body
LE: loop exit
PB: predicated region body
PF: predicated region fallthrough
CT: control target
= control target key end

     0   :  { %11 = vsyncpa [#allocation4], 0  ;;  %s1759_s0 = inlined_call_operand.hbm [shape: f32[16,32], index: 0, kind: input, shape index: {}]   ;;  %s1760_s1 = inlined_call_operand.hbm [shape: f32[32,128], index: 1, kind: input, shape index: {}]   ;;  %s1761_s2 = inlined_call_operand.hbm [shape: f32[32,128], index: 2, kind: input, shape index: {}]   ;;  %s1762_s3 = inlined_call_operand.vmem [shape: f32[1,128], index: 3, kind: input, shape index: {}]   ;;  %s1763_s4 = inlined_call_operand.hbm [shape: f32[8,2,32], index: 4, kind: output, shape index: {0}]   ;;  %s1764_s5 = inlined_call_operand.hbm [shape: f32[8,2,32], index: 5, kind: output, shape index: {1}]  }
   0x1   :  { %12 = vsyncpa [#allocation7], 0 }
   0x2   :  { %13 = vsyncpa [#allocation5], 0 }
   0x3   :  { %14 = vsyncpa [#allocation11], 0  ;;  %s1492_s18 = smov [#allocation6]   ;;  %s1493_s20 = smov [#allocation3]  }
   0x4   :  { %s32_s19 = sshll.u32 %s1492_s18, 4  ;;  %s20_s21 = sshll.u32 %s1493_s20, 4  ;;  %s33_s19 = int_to_ptr.vmem [resolvable:$true] %s32_s19  ;;  %s1536_s21 = int_to_ptr.vmem [resolvable:$true] %s20_s21 }
   0x5   :  { %s1374_s24 = scalar_lea.hbm %s1760_s1, 512 }
   0x6   :  { %p1375_p0 = scmp.ne.s32.totalorder %s1760_s1, %s1374_s24  ;;  %p1378_p1 = scmp.lt.u32.totalorder %s1374_s24, %s1760_s1 }
   0x8   :  { %p1380_p2 = pnand %p1378_p1, %p1375_p0 }
   0xa   :  { %1383 = shalt.err (!%p1380_p2)
}
   0xb   :  { %s1384_s29 = scalar_lea.vmem %s33_s19, 512  ;;  %p1389_p4 = scmp.lt.s32.totalorder %s33_s19, %s33_s19 }
   0xc   :  { %p1385_p3 = scmp.ne.s32.totalorder %s33_s19, %s1384_s29  ;;  %p1390_p5 = scmp.lt.s32.totalorder %s1384_s29, %s1384_s29 }
   0xe   :  { %p1391_p6 = por %p1390_p5, %p1389_p4 }
  0x10   :  { %p1392_p7 = pnand %p1391_p6, %p1385_p3 }
  0x12   :  { %1395 = shalt.err (!%p1392_p7)
}
  0x13   :  { %s1494_s30 = smov 128   ;;  %s1495_s6 = smov 8  }
  0x14   :  { %38 = dma.hbm_to_vmem [thread:$0]  %s1760_s1, 512, %s33_s19, [#allocation7], %s1494_s30, %s1494_s30, %s1495_s6  }
  0x15   :  { %s1396_s11 = scalar_lea.hbm %s1759_s0, 256 }
  0x16   :  { %p1397_p8 = scmp.ne.s32.totalorder %s1759_s0, %s1396_s11  ;;  %p1400_p9 = scmp.lt.u32.totalorder %s1396_s11, %s1759_s0 }
  0x18   :  { %p1402_p10 = pnand %p1400_p9, %p1397_p8 }
  0x1a   :  { %1405 = shalt.err (!%p1402_p10)
}
  0x1b   :  { %s1406_s16 = scalar_lea.vmem %s1536_s21, 256  ;;  %p1411_p12 = scmp.lt.s32.totalorder %s1536_s21, %s1536_s21 }
  0x1c   :  { %p1407_p11 = scmp.ne.s32.totalorder %s1536_s21, %s1406_s16  ;;  %p1412_p13 = scmp.lt.s32.totalorder %s1406_s16, %s1406_s16 }
  0x1e   :  { %p1413_p0 = por %p1412_p13, %p1411_p12 }
  0x20   :  { %p1414_p1 = pnand %p1413_p0, %p1407_p11 }
  0x22   :  { %1417 = shalt.err (!%p1414_p1)
}
  0x23   :  { %26 = dma.hbm_to_vmem [thread:$0]  %s1759_s0, 256, %s1536_s21, [#allocation4], %s1494_s30, %s1494_s30, %s1495_s6  }
  0x24   :  { %s1496_s18 = smov [#allocation8]   ;;  %s1418_s23 = scalar_lea.hbm %s1761_s2, 512 }
  0x25   :  { %s44_s19 = sshll.u32 %s1496_s18, 4  ;;  %p1419_p2 = scmp.ne.s32.totalorder %s1761_s2, %s1418_s23  ;;  %s45_s19 = int_to_ptr.vmem [resolvable:$true] %s44_s19 }
  0x26   :  { %p1422_p3 = scmp.lt.u32.totalorder %s1418_s23, %s1761_s2 }
  0x28   :  { %p1424_p4 = pnand %p1422_p3, %p1419_p2 }
  0x2a   :  { %1427 = shalt.err (!%p1424_p4)
}
  0x2b   :  { %s1428_s28 = scalar_lea.vmem %s45_s19, 512  ;;  %p1433_p6 = scmp.lt.s32.totalorder %s45_s19, %s45_s19 }
  0x2c   :  { %p1429_p5 = scmp.ne.s32.totalorder %s45_s19, %s1428_s28  ;;  %p1434_p7 = scmp.lt.s32.totalorder %s1428_s28, %s1428_s28 }
  0x2e   :  { %p1435_p8 = por %p1434_p7, %p1433_p6 }
  0x30   :  { %p1436_p9 = pnand %p1435_p8, %p1429_p5 }
  0x32   :  { %1439 = shalt.err (!%p1436_p9)
}
  0x33   :  { %50 = dma.hbm_to_vmem [thread:$0]  %s1761_s2, 512, %s45_s19, [#allocation7], %s1494_s30, %s1494_s30, %s1495_s6  }
  0x34   :  { %1484 = dma.done.wait [#allocation4], 256  }
  0x35   :  { %1485 = vsyncadd [#allocation4], 4294967040 }
  0x36   :  { %1486 = dma.done.wait [#allocation7], 1024  }
  0x37   :  { %1487 = vsyncadd [#allocation7], 4294966272  ;;  %v1497_v0 = vmov 0.0|0.0   ;;  %vm1498_vm0 = vmmov 0   ;;  %v1499_v1 = vmov 0.0   ;;  %vm75_vm1 = vcmask 261120  }
  0x38   :  { %1248 = vmatprep.subr.bf16.mxu1 %v1497_v0  ;;  %1160 = vmatprep.mubr.msk.f32.mxu1 %vm1498_vm0, %v1499_v1  ;;  %v64_v2 = vld [vmem:[#allocation6] sm:$0xff]  ;;  %v65_v3 = vld [vmem:[#allocation6 + $0x8] sm:$0xff]  ;;  %v66_v4 = vld [vmem:[#allocation6 + $0x10] sm:$0xff]  ;;  %s1500_s30 = smov 64   ;;  %vm266_vm2 = vcmask 254976   ;;  %s1502_s6 = smov 96  }
  0x39   :  { %v1240_v5 = vpack.c.bf16 %v65_v3, %v64_v2  ;;  %v67_v6 = vld [vmem:[#allocation6 + $0x18] sm:$0xff]  ;;  %v62_v7 = vld [vmem:[#allocation3] sm:$0xff]  ;;  %v159_v9 = vld [vmem:[#allocation8] sm:$0xff]  ;;  %s1503_s7 = smov [#allocation10]  }
  0x3a   :  { %v1244_v8 = vpack.c.bf16 %v67_v6, %v66_v4  ;;  %1149 = vmatprep.mubr.msk.f32.mxu0 %vm75_vm1, %v62_v7  ;;  %v160_v10 = vld [vmem:[#allocation8 + $0x8] sm:$0xff]  ;;  %v161_v11 = vld [vmem:[#allocation8 + $0x10] sm:$0xff]  ;;  %v162_v13 = vld [vmem:[#allocation8 + $0x18] sm:$0xff]  ;;  %s1060_s8 = sshll.u32 %s1503_s7, 4  ;;  %s1061_s8 = int_to_ptr.vmem [resolvable:$true] %s1060_s8 }
  0x3b   :  { %1241 = vmatprep.subr.bf16.mxu0 %v1240_v5  ;;  %v1592_v12 = vpack.c.bf16 %v160_v10, %v159_v9  ;;  %v1595_v14 = vpack.c.bf16 %v162_v13, %v161_v11  ;;  %v63_v15 = vld [vmem:[#allocation3 + $0x8] sm:$0xff]  ;;  %v1077_v16 = vld [vmem:[%s1762_s3] ss:$0 sm:$0xff]  ;;  %s1501_s3 = smov 32   ;;  %s1440_s9 = scalar_lea.vmem %s1061_s8, 256 }
  0x3c   :  { %1243 = vmatpush3.bf16.msra.mxu0 %v1240_v5  ;;  %p1441_p10 = scmp.ne.s32.totalorder %s1061_s8, %s1440_s9  ;;  %p1445_p11 = scmp.lt.s32.totalorder %s1061_s8, %s1061_s8 }
  0x3d   :  { %1245 = vmatprep.subr.bf16.mxu0 %v1244_v8  ;;  %1250 = vmatpush3.bf16.msra.mxu1 %v1592_v12  ;;  %p1446_p12 = scmp.lt.s32.totalorder %s1440_s9, %s1440_s9 }
  0x3e   :  { %1251 = vmatprep.subr.bf16.mxu1 %v1497_v0 }
  0x3f   :  { %p1447_p13 = por %p1446_p12, %p1445_p11 }
  0x40   :  { %1247 = vmatpush3.bf16.msra.mxu0 %v1244_v8 }
  0x41   :  { %1253 = vmatpush3.bf16.msra.mxu1 %v1595_v14  ;;  %1254 = vmatprep.subr.bf16.mxu0 %v1497_v0  ;;  %p1448_p0 = pnand %p1447_p13, %p1441_p10 }
  0x42   :  { %1260 = vmatprep.subr.bf16.mxu1 %v1497_v0 }
  0x43   :  { %1150 = vmatmul.mubr.msk.f32.vlgmr.msra.gmra.mrb[0].mxu0 %vm75_vm1, %v63_v15 }
  0x44   :  { %1161 = vmatmul.mubr.f32.vlgmr.msra.gmra.mrb[0].mxu1 %v1499_v1  ;;  %1256 = vmatpush3.bf16.msra.mxu0 %v1592_v12 }
  0x45   :  { %1257 = vmatprep.subr.bf16.mxu0 %v1497_v0  ;;  %1171 = vmatprep.mubr.msk.f32.mxu0 %vm1498_vm0, %v1499_v1 }
  0x46   :  { %1262 = vmatpush3.bf16.msra.mxu1 %v1592_v12  ;;  %1182 = vmatprep.mubr.msk.f32.mxu1 %vm1498_vm0, %v1499_v1 }
  0x47   :  { %1263 = vmatprep.subr.bf16.mxu1 %v1497_v0 }
  0x48   :  { %1259 = vmatpush3.bf16.msra.mxu0 %v1595_v14 }
  0x49   :  { %1266 = vmatprep.subr.bf16.mxu0 %v1497_v0 }
  0x4a   :  { %1265 = vmatpush3.bf16.msra.mxu1 %v1595_v14 }
  0x4b   :  { %1272 = vmatprep.subr.bf16.mxu1 %v1497_v0 }
 0x116   :  { %v1151_v17 = vpop.f32.mrb[0].mxu0 }
 0x117   :  { %v154_v18 = vadd.f32 %v1151_v17, %v1077_v16  ;;  %v148_v19 = vpop.f32.mrb[1].mxu0  ;;  %v233_v20 = vpop.f32.mrb[0].mxu1 }
 0x118   :  { %v149_v21 = vadd.f32 %v1077_v16, %v148_v19  ;;  %v1162_v22 = vpop.f32.mrb[1].mxu1 }
 0x119   :  { %158 = vst [vmem:[#allocation2 + $0x8] sm:$0xff] %v154_v18 }
 0x11a   :  { %157 = vst [vmem:[#allocation2] sm:$0xff] %v149_v21 }
 0x121   :  { %v163_v23 = vld [vmem:[#allocation2] sm:$0x3]  ;;  %v273_v39 = vld [vmem:[#allocation2 + $0x2] sm:$0x3]  ;;  %v383_v57 = vld [vmem:[#allocation2 + $0x4] sm:$0x3] }
 0x122   :  { %v237_v24 = vadd.f32 %v233_v20, %v163_v23  ;;  %v493_v15 = vld [vmem:[#allocation2 + $0x6] sm:$0x3] }
 0x124   :  { %1310 = vtanh.f32 %v237_v24  ;;  %v1080_v26 = vmul.f32 -1.442695, %v237_v24 }
 0x126   :  { %1312 = vpow2.f32 %v1080_v26 }
 0x12e   :  { %v1311_v25 = vpop.eup %1310 }
 0x12f   :  { %247 = vrot.lane.b32.xlu0 %v1311_v25, %s1500_s30 }
 0x130   :  { %v1313_v27 = vpop.eup %1312 }
 0x131   :  { %v241_v28 = vadd.f32 1.0, %v1313_v27 }
 0x133   :  { %1314 = vrcp.f32 %v241_v28 }
 0x13d   :  { %v1315_v29 = vpop.eup %1314 }
 0x13e   :  { %v245_v32 = vmul.f32 0.0, %v1315_v29 }
 0x1a1   :  { %v248_v30 = vpop.permute.xlu0 %247 }
 0x1a2   :  { %v250_v31 = vmul.f32 %v1315_v29, %v248_v30 }
 0x1a4   :  { %252 = vrot.lane.b32.xlu0 %v250_v31, %s1501_s3 }
 0x216   :  { %v253_v33 = vpop.permute.xlu0 %252 }
 0x217   :  { %v1620_v34 = vadd.f32 %v253_v33, %v245_v32  ;;  %v603_v33 = vld [vmem:[#allocation2 + $0x8] sm:$0x3] }
 0x219   :  { %1316 = vtanh.f32 %v1620_v34 }
 0x223   :  { %v1317_v35 = vpop.eup %1316 }
 0x224   :  { %258 = vrot.lane.b32.xlu1 %v1317_v35, %s1500_s30 }
 0x296   :  { %v259_v36 = vpop.permute.xlu1 %258 }
 0x297   :  { %v261_v37 = vmul.f32 %v1315_v29, %v259_v36 }
 0x299   :  { %263 = vrot.lane.b32.xlu1 %v261_v37, %s1501_s3 }
 0x30b   :  { %v264_v38 = vpop.permute.xlu1 %263 }
 0x30c   :  { %267 = vst.msk [vmem:[#allocation9] sm:$0x3] %vm266_vm2, %v264_v38  ;;  %1172 = vmatmul.mubr.msk.f32.vlgmr.msra.gmra.mrb[2].mxu0 %vm75_vm1, %v264_v38 }
 0x30d   :  { %1268 = vmatpush3.bf16.msra.mxu0 %v1592_v12  ;;  %1193 = vmatprep.mubr.msk.f32.mxu0 %vm1498_vm0, %v1499_v1 }
 0x30e   :  { %1269 = vmatprep.subr.bf16.mxu0 %v1497_v0 }
 0x311   :  { %1271 = vmatpush3.bf16.msra.mxu0 %v1595_v14 }
 0x312   :  { %1278 = vmatprep.subr.bf16.mxu0 %v1497_v0 }
 0x3df   :  { %v342_v40 = vpop.f32.mrb[2].mxu0 }
 0x3e0   :  { %v346_v41 = vadd.f32 %v342_v40, %v273_v39  ;;  %v1173_v42 = vpop.f32.mrb[3].mxu0 }
 0x3e2   :  { %1318 = vtanh.f32 %v346_v41  ;;  %v1082_v44 = vmul.f32 -1.442695, %v346_v41 }
 0x3e4   :  { %1320 = vpow2.f32 %v1082_v44 }
 0x3ec   :  { %v1319_v43 = vpop.eup %1318 }
 0x3ed   :  { %356 = vrot.lane.b32.xlu0 %v1319_v43, %s1500_s30 }
 0x3ee   :  { %v1321_v45 = vpop.eup %1320 }
 0x3ef   :  { %v350_v46 = vadd.f32 1.0, %v1321_v45 }
 0x3f1   :  { %1322 = vrcp.f32 %v350_v46 }
 0x3fb   :  { %v1323_v47 = vpop.eup %1322 }
 0x3fc   :  { %v354_v50 = vmul.f32 %v1323_v47, %v1620_v34 }
 0x45f   :  { %v357_v48 = vpop.permute.xlu0 %356 }
 0x460   :  { %v359_v49 = vmul.f32 %v1323_v47, %v357_v48 }
 0x462   :  { %361 = vrot.lane.b32.xlu1 %v359_v49, %s1501_s3 }
 0x4d4   :  { %v362_v51 = vpop.permute.xlu1 %361 }
 0x4d5   :  { %v1636_v52 = vadd.f32 %v362_v51, %v354_v50 }
 0x4d7   :  { %1324 = vtanh.f32 %v1636_v52 }
 0x4e1   :  { %v1325_v53 = vpop.eup %1324 }
 0x4e2   :  { %367 = vrot.lane.b32.xlu0 %v1325_v53, %s1500_s30  ;;  %v713_v53 = vld [vmem:[#allocation2 + $0xa] sm:$0x3] }
 0x554   :  { %v368_v54 = vpop.permute.xlu0 %367 }
 0x555   :  { %v370_v55 = vmul.f32 %v1323_v47, %v368_v54 }
 0x557   :  { %372 = vrot.lane.b32.xlu1 %v370_v55, %s1501_s3 }
 0x5c9   :  { %v373_v56 = vpop.permute.xlu1 %372 }
 0x5ca   :  { %376 = vst.msk [vmem:[#allocation9 + $0x2] sm:$0x3] %vm266_vm2, %v373_v56  ;;  %1183 = vmatmul.mubr.msk.f32.vlgmr.msra.gmra.mrb[2].mxu1 %vm75_vm1, %v373_v56 }
 0x5cb   :  { %1274 = vmatpush3.bf16.msra.mxu1 %v1592_v12  ;;  %1204 = vmatprep.mubr.msk.f32.mxu1 %vm1498_vm0, %v1499_v1 }
 0x5cc   :  { %1275 = vmatprep.subr.bf16.mxu1 %v1497_v0 }
 0x5cf   :  { %1277 = vmatpush3.bf16.msra.mxu1 %v1595_v14 }
 0x5d0   :  { %1284 = vmatprep.subr.bf16.mxu1 %v1497_v0 }
 0x69d   :  { %v452_v58 = vpop.f32.mrb[2].mxu1 }
 0x69e   :  { %v456_v59 = vadd.f32 %v452_v58, %v383_v57  ;;  %v1184_v60 = vpop.f32.mrb[3].mxu1 }
 0x6a0   :  { %1326 = vtanh.f32 %v456_v59  ;;  %v1084_v62 = vmul.f32 -1.442695, %v456_v59 }
 0x6a2   :  { %1328 = vpow2.f32 %v1084_v62 }
 0x6aa   :  { %v1327_v61 = vpop.eup %1326 }
 0x6ab   :  { %466 = vrot.lane.b32.xlu0 %v1327_v61, %s1500_s30 }
 0x6ac   :  { %v1329_v63 = vpop.eup %1328 }
 0x6ad   :  { %v460_v2 = vadd.f32 1.0, %v1329_v63 }
 0x6af   :  { %1330 = vrcp.f32 %v460_v2 }
 0x6b9   :  { %v1331_v3 = vpop.eup %1330 }
 0x6ba   :  { %v464_v6 = vmul.f32 %v1331_v3, %v1636_v52 }
 0x71d   :  { %v467_v4 = vpop.permute.xlu0 %466 }
 0x71e   :  { %v469_v5 = vmul.f32 %v1331_v3, %v467_v4 }
 0x720   :  { %471 = vrot.lane.b32.xlu1 %v469_v5, %s1501_s3  ;;  %v823_v5 = vld [vmem:[#allocation2 + $0xc] sm:$0x3] }
 0x792   :  { %v472_v7 = vpop.permute.xlu1 %471 }
 0x793   :  { %v1652_v8 = vadd.f32 %v472_v7, %v464_v6 }
 0x795   :  { %1332 = vtanh.f32 %v1652_v8 }
 0x79f   :  { %v1333_v9 = vpop.eup %1332 }
 0x7a0   :  { %477 = vrot.lane.b32.xlu0 %v1333_v9, %s1500_s30 }
 0x812   :  { %v478_v10 = vpop.permute.xlu0 %477 }
 0x813   :  { %v480_v11 = vmul.f32 %v1331_v3, %v478_v10 }
 0x815   :  { %482 = vrot.lane.b32.xlu1 %v480_v11, %s1501_s3 }
 0x887   :  { %v483_v13 = vpop.permute.xlu1 %482 }
 0x888   :  { %486 = vst.msk [vmem:[#allocation9 + $0x4] sm:$0x3] %vm266_vm2, %v483_v13  ;;  %1194 = vmatmul.mubr.msk.f32.vlgmr.msra.gmra.mrb[4].mxu0 %vm75_vm1, %v483_v13 }
 0x889   :  { %1280 = vmatpush3.bf16.msra.mxu0 %v1592_v12  ;;  %1215 = vmatprep.mubr.msk.f32.mxu0 %vm1498_vm0, %v1499_v1 }
 0x88a   :  { %1281 = vmatprep.subr.bf16.mxu0 %v1497_v0 }
 0x88d   :  { %1283 = vmatpush3.bf16.msra.mxu0 %v1595_v14 }
 0x88e   :  { %1290 = vmatprep.subr.bf16.mxu0 %v1497_v0 }
 0x95b   :  { %v562_v16 = vpop.f32.mrb[4].mxu0 }
 0x95c   :  { %v566_v17 = vadd.f32 %v562_v16, %v493_v15  ;;  %v1195_v18 = vpop.f32.mrb[5].mxu0 }
 0x95e   :  { %1334 = vtanh.f32 %v566_v17  ;;  %v1086_v20 = vmul.f32 -1.442695, %v566_v17 }
 0x960   :  { %1336 = vpow2.f32 %v1086_v20 }
 0x968   :  { %v1335_v19 = vpop.eup %1334 }
 0x969   :  { %576 = vrot.lane.b32.xlu0 %v1335_v19, %s1500_s30 }
 0x96a   :  { %v1337_v21 = vpop.eup %1336 }
 0x96b   :  { %v570_v22 = vadd.f32 1.0, %v1337_v21 }
 0x96d   :  { %1338 = vrcp.f32 %v570_v22 }
 0x977   :  { %v1339_v23 = vpop.eup %1338 }
 0x978   :  { %v574_v26 = vmul.f32 %v1339_v23, %v1652_v8 }
 0x9db   :  { %v577_v24 = vpop.permute.xlu0 %576 }
 0x9dc   :  { %v579_v25 = vmul.f32 %v1339_v23, %v577_v24 }
 0x9de   :  { %581 = vrot.lane.b32.xlu1 %v579_v25, %s1501_s3 }
 0xa50   :  { %v582_v27 = vpop.permute.xlu1 %581 }
 0xa51   :  { %v1668_v28 = vadd.f32 %v582_v27, %v574_v26  ;;  %v933_v26 = vld [vmem:[#allocation2 + $0xe] sm:$0x3] }
 0xa53   :  { %1340 = vtanh.f32 %v1668_v28 }
 0xa5d   :  { %v1341_v29 = vpop.eup %1340 }
 0xa5e   :  { %587 = vrot.lane.b32.xlu0 %v1341_v29, %s1500_s30 }
 0xad0   :  { %v588_v30 = vpop.permute.xlu0 %587 }
 0xad1   :  { %v590_v31 = vmul.f32 %v1339_v23, %v588_v30 }
 0xad3   :  { %592 = vrot.lane.b32.xlu1 %v590_v31, %s1501_s3 }
 0xb45   :  { %v593_v32 = vpop.permute.xlu1 %592 }
 0xb46   :  { %596 = vst.msk [vmem:[#allocation9 + $0x6] sm:$0x3] %vm266_vm2, %v593_v32  ;;  %1205 = vmatmul.mubr.msk.f32.vlgmr.msra.gmra.mrb[4].mxu1 %vm75_vm1, %v593_v32 }
 0xb47   :  { %1286 = vmatpush3.bf16.msra.mxu1 %v1592_v12  ;;  %1226 = vmatprep.mubr.msk.f32.mxu1 %vm1498_vm0, %v1499_v1 }
 0xb48   :  { %1287 = vmatprep.subr.bf16.mxu1 %v1497_v0 }
 0xb4b   :  { %1289 = vmatpush3.bf16.msra.mxu1 %v1595_v14 }
 0xc19   :  { %v672_v35 = vpop.f32.mrb[4].mxu1 }
 0xc1a   :  { %v676_v36 = vadd.f32 %v672_v35, %v603_v33  ;;  %v1206_v37 = vpop.f32.mrb[5].mxu1 }
 0xc1c   :  { %1342 = vtanh.f32 %v676_v36  ;;  %v1088_v39 = vmul.f32 -1.442695, %v676_v36 }
 0xc1e   :  { %1344 = vpow2.f32 %v1088_v39 }
 0xc26   :  { %v1343_v38 = vpop.eup %1342 }
 0xc27   :  { %686 = vrot.lane.b32.xlu0 %v1343_v38, %s1500_s30 }
 0xc28   :  { %v1345_v40 = vpop.eup %1344 }
 0xc29   :  { %v680_v41 = vadd.f32 1.0, %v1345_v40 }
 0xc2b   :  { %1346 = vrcp.f32 %v680_v41 }
 0xc35   :  { %v1347_v42 = vpop.eup %1346 }
 0xc36   :  { %v684_v45 = vmul.f32 %v1347_v42, %v1668_v28 }
 0xc99   :  { %v687_v43 = vpop.permute.xlu0 %686 }
 0xc9a   :  { %v689_v44 = vmul.f32 %v1347_v42, %v687_v43 }
 0xc9c   :  { %691 = vrot.lane.b32.xlu1 %v689_v44, %s1501_s3 }
 0xd0e   :  { %v692_v46 = vpop.permute.xlu1 %691 }
 0xd0f   :  { %v1683_v47 = vadd.f32 %v692_v46, %v684_v45 }
 0xd11   :  { %1348 = vtanh.f32 %v1683_v47 }
 0xd1b   :  { %v1349_v48 = vpop.eup %1348 }
 0xd1c   :  { %697 = vrot.lane.b32.xlu0 %v1349_v48, %s1500_s30 }
 0xd8e   :  { %v698_v49 = vpop.permute.xlu0 %697 }
 0xd8f   :  { %v700_v50 = vmul.f32 %v1347_v42, %v698_v49 }
 0xd91   :  { %702 = vrot.lane.b32.xlu1 %v700_v50, %s1501_s3 }
 0xe03   :  { %v703_v51 = vpop.permute.xlu1 %702 }
 0xe04   :  { %706 = vst.msk [vmem:[#allocation9 + $0x8] sm:$0x3] %vm266_vm2, %v703_v51  ;;  %1216 = vmatmul.mubr.msk.f32.vlgmr.msra.gmra.mrb[6].mxu0 %vm75_vm1, %v703_v51 }
 0xe05   :  { %1292 = vmatpush3.bf16.msra.mxu0 %v1592_v12  ;;  %1237 = vmatprep.mubr.msk.f32.mxu0 %vm1498_vm0, %v1499_v1 }
 0xe06   :  { %1293 = vmatprep.subr.bf16.mxu0 %v1497_v0 }
 0xe09   :  { %1295 = vmatpush3.bf16.msra.mxu0 %v1595_v14 }
 0xed7   :  { %v782_v54 = vpop.f32.mrb[6].mxu0 }
 0xed8   :  { %v786_v55 = vadd.f32 %v782_v54, %v713_v53  ;;  %v1217_v56 = vpop.f32.mrb[7].mxu0 }
 0xeda   :  { %1350 = vtanh.f32 %v786_v55  ;;  %v1090_v58 = vmul.f32 -1.442695, %v786_v55 }
 0xedc   :  { %1352 = vpow2.f32 %v1090_v58 }
 0xee4   :  { %v1351_v57 = vpop.eup %1350 }
 0xee5   :  { %796 = vrot.lane.b32.xlu0 %v1351_v57, %s1500_s30 }
 0xee6   :  { %v1353_v59 = vpop.eup %1352 }
 0xee7   :  { %v790_v60 = vadd.f32 1.0, %v1353_v59 }
 0xee9   :  { %1354 = vrcp.f32 %v790_v60 }
 0xef3   :  { %v1355_v12 = vpop.eup %1354 }
 0xef4   :  { %v794_v0 = vmul.f32 %v1355_v12, %v1683_v47 }
 0xf57   :  { %v797_v61 = vpop.permute.xlu0 %796 }
 0xf58   :  { %v799_v1 = vmul.f32 %v1355_v12, %v797_v61 }
 0xf5a   :  { %801 = vrot.lane.b32.xlu1 %v799_v1, %s1501_s3 }
 0xfcc   :  { %v802_v14 = vpop.permute.xlu1 %801 }
 0xfcd   :  { %v1698_v62 = vadd.f32 %v802_v14, %v794_v0 }
 0xfcf   :  { %1356 = vtanh.f32 %v1698_v62 }
 0xfd9   :  { %v1357_v63 = vpop.eup %1356 }
 0xfda   :  { %807 = vrot.lane.b32.xlu0 %v1357_v63, %s1500_s30 }
0x104c   :  { %v808_v2 = vpop.permute.xlu0 %807 }
0x104d   :  { %v810_v3 = vmul.f32 %v1355_v12, %v808_v2 }
0x104f   :  { %812 = vrot.lane.b32.xlu1 %v810_v3, %s1501_s3 }
0x10c1   :  { %v813_v4 = vpop.permute.xlu1 %812 }
0x10c2   :  { %816 = vst.msk [vmem:[#allocation9 + $0xa] sm:$0x3] %vm266_vm2, %v813_v4  ;;  %1227 = vmatmul.mubr.msk.f32.vlgmr.msra.gmra.mrb[6].mxu1 %vm75_vm1, %v813_v4 }
0x1195   :  { %v892_v6 = vpop.f32.mrb[6].mxu1 }
0x1196   :  { %v896_v7 = vadd.f32 %v892_v6, %v823_v5  ;;  %v1228_v9 = vpop.f32.mrb[7].mxu1 }
0x1198   :  { %1358 = vtanh.f32 %v896_v7  ;;  %v1092_v11 = vmul.f32 -1.442695, %v896_v7 }
0x119a   :  { %1360 = vpow2.f32 %v1092_v11 }
0x11a2   :  { %v1359_v10 = vpop.eup %1358 }
0x11a3   :  { %906 = vrot.lane.b32.xlu0 %v1359_v10, %s1500_s30 }
0x11a4   :  { %v1361_v13 = vpop.eup %1360 }
0x11a5   :  { %v900_v15 = vadd.f32 1.0, %v1361_v13 }
0x11a7   :  { %1362 = vrcp.f32 %v900_v15 }
0x11b1   :  { %v1363_v16 = vpop.eup %1362 }
0x11b2   :  { %v904_v19 = vmul.f32 %v1363_v16, %v1698_v62 }
0x1215   :  { %v907_v17 = vpop.permute.xlu0 %906 }
0x1216   :  { %v909_v18 = vmul.f32 %v1363_v16, %v907_v17 }
0x1218   :  { %911 = vrot.lane.b32.xlu1 %v909_v18, %s1501_s3 }
0x128a   :  { %v912_v20 = vpop.permute.xlu1 %911 }
0x128b   :  { %v914_v21 = vadd.f32 %v912_v20, %v904_v19 }
0x128d   :  { %1364 = vtanh.f32 %v914_v21 }
0x1297   :  { %v1365_v22 = vpop.eup %1364 }
0x1298   :  { %917 = vrot.lane.b32.xlu0 %v1365_v22, %s1500_s30 }
0x130a   :  { %v918_v23 = vpop.permute.xlu0 %917 }
0x130b   :  { %v920_v24 = vmul.f32 %v1363_v16, %v918_v23 }
0x130d   :  { %922 = vrot.lane.b32.xlu1 %v920_v24, %s1501_s3 }
0x137f   :  { %v923_v25 = vpop.permute.xlu1 %922 }
0x1380   :  { %926 = vst.msk [vmem:[#allocation9 + $0xc] sm:$0x3] %vm266_vm2, %v923_v25  ;;  %1238 = vmatmul.mubr.msk.f32.vlgmr.msra.gmra.mrb[8].mxu0 %vm75_vm1, %v923_v25 }
0x1453   :  { %v1002_v27 = vpop.f32.mrb[8].mxu0 }
0x1454   :  { %v1006_v29 = vadd.f32 %v1002_v27, %v933_v26  ;;  %v1239_v30 = vpop.f32.mrb[9].mxu0 }
0x1456   :  { %1366 = vtanh.f32 %v1006_v29  ;;  %v1094_v32 = vmul.f32 -1.442695, %v1006_v29 }
0x1458   :  { %1368 = vpow2.f32 %v1094_v32 }
0x1460   :  { %v1367_v31 = vpop.eup %1366 }
0x1461   :  { %1016 = vrot.lane.b32.xlu0 %v1367_v31, %s1500_s30 }
0x1462   :  { %v1369_v33 = vpop.eup %1368 }
0x1463   :  { %v1010_v35 = vadd.f32 1.0, %v1369_v33 }
0x1465   :  { %1370 = vrcp.f32 %v1010_v35 }
0x146f   :  { %v1371_v36 = vpop.eup %1370 }
0x1470   :  { %v1014_v39 = vmul.f32 %v1371_v36, %v914_v21 }
0x14d3   :  { %v1017_v37 = vpop.permute.xlu0 %1016 }
0x14d4   :  { %v1019_v38 = vmul.f32 %v1371_v36, %v1017_v37 }
0x14d6   :  { %1021 = vrot.lane.b32.xlu1 %v1019_v38, %s1501_s3 }
0x14da   :  { %269 = vrot.lane.b32.xlu1 %v1620_v34, %s1502_s6 }
0x14de   :  { %488 = vrot.lane.b32.xlu1 %v1652_v8, %s1502_s6 }
0x14e2   :  { %708 = vrot.lane.b32.xlu1 %v1683_v47, %s1502_s6 }
0x14e6   :  { %928 = vrot.lane.b32.xlu1 %v914_v21, %s1502_s6 }
0x1548   :  { %v1022_v40 = vpop.permute.xlu1 %1021 }
0x1549   :  { %v1024_v41 = vadd.f32 %v1022_v40, %v1014_v39 }
0x154b   :  { %1372 = vtanh.f32 %v1024_v41  ;;  %1038 = vrot.lane.b32.xlu1 %v1024_v41, %s1502_s6 }
0x154c   :  { %v270_v42 = vpop.permute.xlu1 %269 }
0x154d   :  { %272 = vst.msk [vmem:[#allocation10] sm:$0x3] %vm266_vm2, %v270_v42 }
0x1550   :  { %v489_v43 = vpop.permute.xlu1 %488 }
0x1551   :  { %492 = vst.msk [vmem:[#allocation10 + $0x4] sm:$0x3] %vm266_vm2, %v489_v43 }
0x1554   :  { %v709_v44 = vpop.permute.xlu1 %708 }
0x1555   :  { %v1373_v45 = vpop.eup %1372  ;;  %712 = vst.msk [vmem:[#allocation10 + $0x8] sm:$0x3] %vm266_vm2, %v709_v44 }
0x1556   :  { %1027 = vrot.lane.b32.xlu0 %v1373_v45, %s1500_s30 }
0x1558   :  { %v929_v34 = vpop.permute.xlu1 %928 }
0x1559   :  { %932 = vst.msk [vmem:[#allocation10 + $0xc] sm:$0x3] %vm266_vm2, %v929_v34 }
0x155a   :  { %378 = vrot.lane.b32.xlu0 %v1636_v52, %s1502_s6 }
0x155e   :  { %598 = vrot.lane.b32.xlu0 %v1668_v28, %s1502_s6 }
0x1562   :  { %818 = vrot.lane.b32.xlu0 %v1698_v62, %s1502_s6 }
0x15bd   :  { %v1039_v8 = vpop.permute.xlu1 %1038 }
0x15be   :  { %1042 = vst.msk [vmem:[#allocation10 + $0xe] sm:$0x3] %vm266_vm2, %v1039_v8 }
0x15c8   :  { %v1028_v46 = vpop.permute.xlu0 %1027 }
0x15c9   :  { %v1030_v47 = vmul.f32 %v1371_v36, %v1028_v46 }
0x15cb   :  { %1032 = vrot.lane.b32.xlu0 %v1030_v47, %s1501_s3 }
0x15cc   :  { %v379_v48 = vpop.permute.xlu0 %378 }
0x15cd   :  { %382 = vst.msk [vmem:[#allocation10 + $0x2] sm:$0x3] %vm266_vm2, %v379_v48 }
0x15d0   :  { %v599_v49 = vpop.permute.xlu0 %598 }
0x15d1   :  { %602 = vst.msk [vmem:[#allocation10 + $0x6] sm:$0x3] %vm266_vm2, %v599_v49 }
0x15d4   :  { %v819_v52 = vpop.permute.xlu0 %818 }
0x15d5   :  { %822 = vst.msk [vmem:[#allocation10 + $0xa] sm:$0x3] %vm266_vm2, %v819_v52 }
0x15d6   :  { %1451 = shalt.err (!%p1448_p0)
}
0x15d7   :  { %s1452_s12 = scalar_lea.hbm %s1764_s5, 256 }
0x15d8   :  { %p1453_p1 = scmp.ne.s32.totalorder %s1764_s5, %s1452_s12  ;;  %p1456_p2 = scmp.lt.u32.totalorder %s1452_s12, %s1764_s5 }
0x15da   :  { %p1458_p3 = pnand %p1456_p2, %p1453_p1 }
0x15dc   :  { %1461 = shalt.err (!%p1458_p3)
}
0x15dd   :  { %s1504_s1 = smov 2   ;;  %s1505_s19 = smov [#allocation9]  }
0x15de   :  { %1066 = dma.vmem_to_hbm [thread:$0]  %s1061_s8, 256, %s1764_s5, [#allocation11], %s1501_s3, %s1501_s3, %s1504_s1  }
0x15df   :  { %s1048_s20 = sshll.u32 %s1505_s19, 4  ;;  %s1049_s20 = int_to_ptr.vmem [resolvable:$true] %s1048_s20 }
0x15e0   :  { %s1462_s22 = scalar_lea.vmem %s1049_s20, 256  ;;  %p1467_p5 = scmp.lt.s32.totalorder %s1049_s20, %s1049_s20 }
0x15e1   :  { %p1463_p4 = scmp.ne.s32.totalorder %s1049_s20, %s1462_s22  ;;  %p1468_p6 = scmp.lt.s32.totalorder %s1462_s22, %s1462_s22 }
0x15e3   :  { %p1469_p7 = por %p1468_p6, %p1467_p5 }
0x15e5   :  { %p1470_p8 = pnand %p1469_p7, %p1463_p4 }
0x163d   :  { %v1033_v28 = vpop.permute.xlu0 %1032 }
0x163e   :  { %1036 = vst.msk [vmem:[#allocation9 + $0xe] sm:$0x3] %vm266_vm2, %v1033_v28 }
0x163f   :  { %1473 = shalt.err (!%p1470_p8)
}
0x1640   :  { %s1474_s25 = scalar_lea.hbm %s1763_s4, 256 }
0x1641   :  { %p1475_p9 = scmp.ne.s32.totalorder %s1763_s4, %s1474_s25  ;;  %p1478_p10 = scmp.lt.u32.totalorder %s1474_s25, %s1763_s4 }
0x1643   :  { %p1480_p11 = pnand %p1478_p10, %p1475_p9 }
0x1645   :  { %1483 = shalt.err (!%p1480_p11)
}
0x1646   :  { %1054 = dma.vmem_to_hbm [thread:$0]  %s1049_s20, 256, %s1763_s4, [#allocation5], %s1501_s3, %s1501_s3, %s1504_s1  }
0x1647   :  { %1488 = dma.done.wait [#allocation5], 256  }
0x1648   :  { %1489 = vsyncadd [#allocation5], 4294967040 }
0x1649   :  { %1490 = dma.done.wait [#allocation11], 256  }
0x164a   :  { %1491 = vsyncadd [#allocation11], 4294967040 }
0x164b   :  { %1073 = vsyncpa [#allocation4], 1 }
0x164c   :  { %1074 = vsyncpa [#allocation7], 1 }
0x164d   :  { %1075 = vsyncpa [#allocation5], 1 }
0x164e   :  { %1076 = vsyncpa [#allocation11], 1 }

</bundles_post_ra>
